<compile_context>
chip_gen: v6e
topology: v6e:2x2x1
jax: 0.10.0
libtpu: 0.0.40
codegen_flags: <defaults>
</compile_context>

<pallas_src>
import functools

import numpy as np
import jax
import jax.numpy as jnp
from jax import lax
from jax.experimental import pallas as pl
from jax.experimental.pallas import tpu as pltpu


def _bn_relu_conv_kernel(x_ref, gb_ref, chan_ref, w_ref, b_ref, o_ref, *,
                         H, HO, P, S, KH, eps, inv_count, mxu_dtype):
    """Fused BN stats + BN apply + ReLU + conv (one Toeplitz matmul).

    x_ref:    (N, Hp, WpC)        zero-padded raw input, NHWC row-flattened,
                                  lane-padded to WpC % 128 == 0
    gb_ref:   (2, WpC)            gamma (row 0) / beta (row 1) per column,
                                  zeroed in pad columns
    chan_ref: (WpC, WpC)          0/1 matrix: [k, j] = 1 iff cols k, j are both
                                  valid image columns of the same channel
    w_ref:    (KH*WpC, WO*COUT)   row-Toeplitz conv weights (zero pad rows)
    b_ref:    (1, WO*COUT)        conv bias tiled over WO
    o_ref:    (N*HO, WO*COUT)     lane-dense output block
    """
    N, Hp, WpC = x_ref.shape
    x = x_ref[...]                                            # f32

    # ---- Training-mode BatchNorm statistics, fused in-kernel --------------
    # Padded rows/columns of x are exactly zero, so whole-block sums equal the
    # sums over the valid N*H*W region; divide by the true element count.
    # One (8, WpC) x (WpC, WpC) matmul folds per-column sums to per-channel
    # values AND broadcasts them back per column (pad columns -> 0).
    x2d = x.reshape(N * Hp, WpC)
    col_sum = jnp.sum(x2d, axis=0, keepdims=True)             # (1, WpC)
    col_sq = jnp.sum(x2d * x2d, axis=0, keepdims=True)        # (1, WpC)
    stats = jnp.concatenate(                                  # pad M to a full
        [col_sum, col_sq, jnp.zeros((6, WpC), jnp.float32)],  # 8-sublane tile
        axis=0)
    expanded = jnp.dot(stats, chan_ref[...],
                       preferred_element_type=jnp.float32)    # (8, WpC)
    mean_row = expanded[0:1] * inv_count                      # per-column mean
    var_row = expanded[1:2] * inv_count - mean_row * mean_row # biased variance

    gamma_row = gb_ref[0:1]
    beta_row = gb_ref[1:2]
    scale_row = gamma_row * lax.rsqrt(var_row + eps)          # 0 in pad cols
    shift_row = beta_row - mean_row * scale_row               # 0 in pad cols

    # ---- BN apply + ReLU (f32); pad rows forced back to exact zero --------
    act = jnp.maximum(x * scale_row + shift_row, 0.0)
    r = lax.broadcasted_iota(jnp.int32, act.shape, 1)
    act = jnp.where((r >= P) & (r < P + H), act, 0.0)
    act = act.astype(mxu_dtype)                               # single cast

    # ---- Conv as ONE matmul: concat KH shifted row-slices along lanes -----
    taps = [lax.slice(act, (0, kh, 0),
                      (N, kh + (HO - 1) * S + 1, WpC), (1, S, 1))
            for kh in range(KH)]                              # each (N,HO,WpC)
    lhs = jnp.concatenate(taps, axis=-1).reshape(N * HO, KH * WpC)
    out = jnp.dot(lhs, w_ref[...], preferred_element_type=jnp.float32)
    o_ref[...] = (out + b_ref[...]).astype(o_ref.dtype)


def basic_conv2d(x_nchw, gamma, beta, w_oihw, bias, *, kernel_size, stride,
                 padding, eps=1e-5, mxu_dtype=jnp.float32, out_format="NCHW"):
    """BasicConv2d.forward: conv(relu(bn(x))). Input is NCHW float32.

    mxu_dtype=jnp.bfloat16 feeds the MXU bf16 operands (2-3x matmul throughput
    on v5e, v6e and v7x alike - the MXU is bf16-native on all of them) while
    keeping f32 accumulation and f32 elementwise BN/ReLU math; the default
    f32 matches the PyTorch module.  out_format="NHWC" skips the final NCHW
    transpose for consumers that can take channel-last (e.g. a following
    BasicConv2d), saving an extra HBM round trip.
    """
    N, C, H, W = x_nchw.shape
    COUT = w_oihw.shape[0]
    KH = KW = kernel_size
    S, P = stride, padding
    HO = (H + 2 * P - KH) // S + 1
    WO = (W + 2 * P - KW) // S + 1
    Hp, Wp = H + 2 * P, W + 2 * P
    WpC = Wp * C
    WpC_pad = ((WpC + 127) // 128) * 128          # lane-dense K blocks
    pad_cols = WpC_pad - WpC
    WOC = WO * COUT

    x = jnp.transpose(x_nchw, (0, 2, 3, 1)).astype(jnp.float32)       # NHWC

    # Spatial zero padding (+ lane padding of the flattened row to a multiple
    # of 128) of the raw input: one jnp.pad, dense DMA into the kernel.
    if pad_cols % C == 0:
        x_flat = jnp.pad(
            x, ((0, 0), (P, P), (P, P + pad_cols // C), (0, 0))
        ).reshape(N, Hp, WpC_pad)
    else:
        x_flat = jnp.pad(
            jnp.pad(x, ((0, 0), (P, P), (P, P), (0, 0))).reshape(N, Hp, WpC),
            ((0, 0), (0, 0), (0, pad_cols)))

    # ---- Host-built (numpy) structural constants: no per-call XLA op chains.
    col = np.arange(WpC_pad)
    w_idx, c_idx = col // C, col % C
    col_valid = (col < WpC) & (w_idx >= P) & (w_idx < P + W)  # real image cols
    chan_mat = jnp.asarray(
        (col_valid[:, None] & col_valid[None, :]
         & (c_idx[:, None] == c_idx[None, :])).astype(np.float32))

    # gamma/beta per column, zeroed in pad columns (exact gathers, no matmul).
    cv = jnp.asarray(col_valid)
    gamma_row = jnp.where(cv, gamma.astype(jnp.float32)[c_idx], 0.0)
    beta_row = jnp.where(cv, beta.astype(jnp.float32)[c_idx], 0.0)
    gb_rows = jnp.stack([gamma_row, beta_row], axis=0)        # (2, WpC_pad)

    # Row-Toeplitz conv weights: one einsum against a host-built 0/1 tap
    # selector (instead of WO dynamic-update-slices per call).
    # TODO(synk): for real Inception shapes (C/COUT up to 1024, H,W ~35-149)
    # replace the Toeplitz slab with dense (C, COUT) shifted-window matmuls
    # tiled over COUT/HO grid axes (marked "parallel" so v7x's 2nd TensorCore
    # is used) with a VMEM f32 accumulator + pl.when init/finalize on a
    # trailing "arbitrary" K axis, size tiles x 2 buffers for v7x's 64 MiB
    # VMEM via vmem_limit_bytes, compute BN stats with a grid reduction, and
    # precompute/cache the derived weights outside the per-call path.
    tap = np.zeros((KW, Wp, WO), np.float32)
    for kw in range(KW):
        for wo in range(WO):
            tap[kw, wo * S + kw, wo] = 1.0
    w_hwio = jnp.transpose(w_oihw, (2, 3, 1, 0)).astype(jnp.float32)  # KH,KW,C,COUT
    w_big = jnp.einsum("hkcd,kwo->hwcod", w_hwio, jnp.asarray(tap),
                       precision=lax.Precision.HIGHEST)       # KH,Wp,C,WO,COUT
    w_big = w_big.reshape(KH, WpC, WOC)
    if pad_cols:
        w_big = jnp.pad(w_big, ((0, 0), (0, pad_cols), (0, 0)))
    w_big = w_big.reshape(KH * WpC_pad, WOC).astype(mxu_dtype)

    bias_row = jnp.tile(bias.astype(jnp.float32), WO).reshape(1, WOC)

    kernel = functools.partial(
        _bn_relu_conv_kernel, H=H, HO=HO, P=P, S=S, KH=KH, eps=eps,
        inv_count=1.0 / (N * H * W), mxu_dtype=mxu_dtype)

    out2d = pl.pallas_call(
        kernel,
        out_shape=jax.ShapeDtypeStruct((N * HO, WOC), jnp.float32),
        grid_spec=pltpu.PrefetchScalarGridSpec(
            num_scalar_prefetch=0,
            grid=(1,),   # whole toy problem in one VMEM-resident step
            in_specs=[
                pl.BlockSpec((N, Hp, WpC_pad), lambda i: (0, 0, 0)),
                pl.BlockSpec((2, WpC_pad), lambda i: (0, 0)),
                pl.BlockSpec((WpC_pad, WpC_pad), lambda i: (0, 0)),
                pl.BlockSpec((KH * WpC_pad, WOC), lambda i: (0, 0)),
                pl.BlockSpec((1, WOC), lambda i: (0, 0)),
            ],
            out_specs=pl.BlockSpec((N * HO, WOC), lambda i: (0, 0)),
        ),
        compiler_params=pltpu.CompilerParams(
            dimension_semantics=("parallel",)),
    )(x_flat, gb_rows, chan_mat, w_big, bias_row)

    out = out2d.reshape(N, HO, WO, COUT)
    if out_format == "NHWC":
        return out
    return jnp.transpose(out, (0, 3, 1, 2))                   # back to NCHW


def reference_basic_conv2d(x_nchw, gamma, beta, w_oihw, bias, *, stride,
                           padding, eps=1e-5):
    """Pure-JAX reference matching PyTorch training-mode BN -> ReLU -> Conv."""
    mean = jnp.mean(x_nchw, axis=(0, 2, 3), keepdims=True)
    var = jnp.mean((x_nchw - mean) ** 2, axis=(0, 2, 3), keepdims=True)
    xn = (x_nchw - mean) / jnp.sqrt(var + eps)
    act = jnp.maximum(xn * gamma.reshape(1, -1, 1, 1)
                      + beta.reshape(1, -1, 1, 1), 0.0)
    out = lax.conv_general_dilated(
        act, w_oihw, window_strides=(stride, stride),
        padding=[(padding, padding), (padding, padding)],
        dimension_numbers=("NCHW", "OIHW", "NCHW"))
    return out + bias.reshape(1, -1, 1, 1)


if __name__ == "__main__":
    # module config: BasicConv2d(in_channels=4, out_channels=8,
    #                            kernel_size=3, stride=1, padding=1)
    IN_C, OUT_C, K, STRIDE, PAD = 4, 8, 3, 1, 1
    N, H, W = 2, 16, 16

    key = jax.random.PRNGKey(0)
    kx, kg, kb, kw, kbias = jax.random.split(key, 5)

    x = jax.random.normal(kx, (N, IN_C, H, W), dtype=jnp.float32)
    gamma = 1.0 + 0.1 * jax.random.normal(kg, (IN_C,), dtype=jnp.float32)
    beta = 0.1 * jax.random.normal(kb, (IN_C,), dtype=jnp.float32)
    conv_w = 0.1 * jax.random.normal(kw, (OUT_C, IN_C, K, K), dtype=jnp.float32)
    conv_b = 0.1 * jax.random.normal(kbias, (OUT_C,), dtype=jnp.float32)

    ref = reference_basic_conv2d(x, gamma, beta, conv_w, conv_b,
                                 stride=STRIDE, padding=PAD)
    ref = jax.block_until_ready(ref)

    # f32 MXU path (matches module semantics; tolerance covers the in-kernel
    # one-pass E[x^2]-mean^2 variance reordering).
    out = basic_conv2d(x, gamma, beta, conv_w, conv_b,
                       kernel_size=K, stride=STRIDE, padding=PAD)
    out = jax.block_until_ready(out)
    assert out.shape == (N, OUT_C, H, W), out.shape
    np.testing.assert_allclose(np.asarray(out), np.asarray(ref),
                               rtol=5e-4, atol=5e-4)

    # bf16 MXU operands (fast path on v5e/v6e/v7x), f32 accumulation.
    out_bf16 = basic_conv2d(x, gamma, beta, conv_w, conv_b,
                            kernel_size=K, stride=STRIDE, padding=PAD,
                            mxu_dtype=jnp.bfloat16)
    out_bf16 = jax.block_until_ready(out_bf16)
    np.testing.assert_allclose(np.asarray(out_bf16), np.asarray(ref),
                               rtol=5e-2, atol=5e-2)

    # NHWC output path (skips the final NCHW transpose for chained layers).
    out_nhwc = basic_conv2d(x, gamma, beta, conv_w, conv_b,
                            kernel_size=K, stride=STRIDE, padding=PAD,
                            out_format="NHWC")
    out_nhwc = jax.block_until_ready(out_nhwc)
    np.testing.assert_allclose(np.transpose(np.asarray(out_nhwc), (0, 3, 1, 2)),
                               np.asarray(ref), rtol=5e-4, atol=5e-4)

    print("KERNEL_OK")
</pallas_src>

<mosaic_0001>
module attributes {stable_mosaic.version = 11 : i64} {
  func.func @_bn_relu_conv_kernel(%arg0: i32, %arg1: memref<2x18x128xf32, #tpu.memory_space<vmem>>, %arg2: memref<2x128xf32, #tpu.memory_space<vmem>>, %arg3: memref<128x128xf32, #tpu.memory_space<vmem>>, %arg4: memref<384x128xf32, #tpu.memory_space<vmem>>, %arg5: memref<1x128xf32, #tpu.memory_space<vmem>>, %arg6: memref<32x128xf32, #tpu.memory_space<vmem>>) attributes {dimension_semantics = [#tpu.dimension_semantics<parallel>], iteration_bounds = array<i64: 1>, scalar_prefetch = 0 : i64, scratch_operands = 0 : i64, tpu.core_type = #tpu.core_type<tc>, window_params = [{pipeline_mode = #tpu.pipeline_mode<synchronous>, transform_indices = @transform_0, window_bounds = array<i64: 2, 18, 128>}, {pipeline_mode = #tpu.pipeline_mode<synchronous>, transform_indices = @transform_1, window_bounds = array<i64: 2, 128>}, {pipeline_mode = #tpu.pipeline_mode<synchronous>, transform_indices = @transform_2, window_bounds = array<i64: 128, 128>}, {pipeline_mode = #tpu.pipeline_mode<synchronous>, transform_indices = @transform_3, window_bounds = array<i64: 384, 128>}, {pipeline_mode = #tpu.pipeline_mode<synchronous>, transform_indices = @transform_4, window_bounds = array<i64: 1, 128>}, {pipeline_mode = #tpu.pipeline_mode<synchronous>, transform_indices = @transform_5, window_bounds = array<i64: 32, 128>}]} {
    %c0 = arith.constant 0 : index
    %c0_0 = arith.constant 0 : index
    %c0_1 = arith.constant 0 : index
    %0 = vector.load %arg1[%c0, %c0_0, %c0_1] : memref<2x18x128xf32, #tpu.memory_space<vmem>>, vector<2x18x128xf32>
    %1 = vector.shape_cast %0 : vector<2x18x128xf32> to vector<36x128xf32>
    %cst = arith.constant dense<0.000000e+00> : vector<128xf32>
    %2 = vector.multi_reduction <add>, %1, %cst [0] : vector<36x128xf32> to vector<128xf32>
    %3 = vector.shape_cast %2 : vector<128xf32> to vector<1x128xf32>
    %4 = arith.mulf %1, %1 : vector<36x128xf32>
    %cst_2 = arith.constant dense<0.000000e+00> : vector<128xf32>
    %5 = vector.multi_reduction <add>, %4, %cst_2 [0] : vector<36x128xf32> to vector<128xf32>
    %6 = vector.shape_cast %5 : vector<128xf32> to vector<1x128xf32>
    %cst_3 = arith.constant 0.000000e+00 : f32
    %7 = vector.broadcast %cst_3 : f32 to vector<6x128xf32>
    %8 = tpu.concatenate %3, %6, %7 in 0 : vector<1x128xf32>, vector<1x128xf32>, vector<6x128xf32> -> vector<8x128xf32>
    %c0_4 = arith.constant 0 : index
    %c0_5 = arith.constant 0 : index
    %9 = vector.load %arg3[%c0_4, %c0_5] : memref<128x128xf32, #tpu.memory_space<vmem>>, vector<128x128xf32>
    %cst_6 = arith.constant dense<0.000000e+00> : vector<8x128xf32>
    %10 = tpu.matmul %8, %9, %cst_6 {dimension_numbers = #tpu.dot_dimension_numbers<[1], [0], [0], [1], [0, 0, 1, 1], [], []>} : vector<8x128xf32>, vector<128x128xf32>, vector<8x128xf32> -> vector<8x128xf32>
    %11 = vector.extract_strided_slice %10 {offsets = [0, 0], sizes = [1, 128], strides = [1, 1]} : vector<8x128xf32> to vector<1x128xf32>
    %cst_7 = arith.constant 0.001953125 : f32
    %12 = vector.broadcast %cst_7 : f32 to vector<1x128xf32>
    %13 = arith.mulf %11, %12 : vector<1x128xf32>
    %14 = vector.extract_strided_slice %10 {offsets = [1, 0], sizes = [1, 128], strides = [1, 1]} : vector<8x128xf32> to vector<1x128xf32>
    %cst_8 = arith.constant 0.001953125 : f32
    %15 = vector.broadcast %cst_8 : f32 to vector<1x128xf32>
    %16 = arith.mulf %14, %15 : vector<1x128xf32>
    %17 = arith.mulf %13, %13 : vector<1x128xf32>
    %18 = arith.subf %16, %17 : vector<1x128xf32>
    %c0_9 = arith.constant 0 : index
    %c0_10 = arith.constant 0 : index
    %19 = vector.load %arg2[%c0_9, %c0_10] : memref<2x128xf32, #tpu.memory_space<vmem>>, vector<1x128xf32>
    %c1 = arith.constant 1 : index
    %c0_11 = arith.constant 0 : index
    %20 = vector.load %arg2[%c1, %c0_11] : memref<2x128xf32, #tpu.memory_space<vmem>>, vector<1x128xf32>
    %cst_12 = arith.constant 9.99999974E-6 : f32
    %21 = vector.broadcast %cst_12 : f32 to vector<1x128xf32>
    %22 = arith.addf %18, %21 : vector<1x128xf32>
    %23 = math.rsqrt %22 : vector<1x128xf32>
    %24 = arith.mulf %19, %23 : vector<1x128xf32>
    %25 = arith.mulf %13, %24 : vector<1x128xf32>
    %26 = arith.subf %20, %25 : vector<1x128xf32>
    %27 = vector.shape_cast %24 : vector<1x128xf32> to vector<1x1x128xf32>
    %28 = vector.broadcast %27 : vector<1x1x128xf32> to vector<2x18x128xf32>
    %29 = arith.mulf %0, %28 : vector<2x18x128xf32>
    %30 = vector.shape_cast %26 : vector<1x128xf32> to vector<1x1x128xf32>
    %31 = vector.broadcast %30 : vector<1x1x128xf32> to vector<2x18x128xf32>
    %32 = arith.addf %29, %31 : vector<2x18x128xf32>
    %cst_13 = arith.constant 0.000000e+00 : f32
    %33 = vector.broadcast %cst_13 : f32 to vector<2x18x128xf32>
    %34 = arith.maximumf %32, %33 : vector<2x18x128xf32>
    %35 = tpu.iota {dimensions = array<i32: 1>} : vector<2x18x128xi32>
    %c1_i32 = arith.constant 1 : i32
    %36 = vector.broadcast %c1_i32 : i32 to vector<2x18x128xi32>
    %37 = arith.cmpi sge, %35, %36 : vector<2x18x128xi32>
    %c17_i32 = arith.constant 17 : i32
    %38 = vector.broadcast %c17_i32 : i32 to vector<2x18x128xi32>
    %39 = arith.cmpi slt, %35, %38 : vector<2x18x128xi32>
    %40 = arith.andi %37, %39 : vector<2x18x128xi1>
    %cst_14 = arith.constant 0.000000e+00 : f32
    %41 = vector.broadcast %cst_14 : f32 to vector<2x18x128xf32>
    %42 = arith.select %40, %34, %41 : vector<2x18x128xi1>, vector<2x18x128xf32>
    %43 = vector.extract_strided_slice %42 {offsets = [0, 0, 0], sizes = [2, 16, 128], strides = [1, 1, 1]} : vector<2x18x128xf32> to vector<2x16x128xf32>
    %44 = vector.extract_strided_slice %42 {offsets = [0, 1, 0], sizes = [2, 16, 128], strides = [1, 1, 1]} : vector<2x18x128xf32> to vector<2x16x128xf32>
    %45 = vector.extract_strided_slice %42 {offsets = [0, 2, 0], sizes = [2, 16, 128], strides = [1, 1, 1]} : vector<2x18x128xf32> to vector<2x16x128xf32>
    %46 = tpu.concatenate %43, %44, %45 in 2 : vector<2x16x128xf32>, vector<2x16x128xf32>, vector<2x16x128xf32> -> vector<2x16x384xf32>
    %47 = vector.shape_cast %46 : vector<2x16x384xf32> to vector<32x384xf32>
    %c0_15 = arith.constant 0 : index
    %c0_16 = arith.constant 0 : index
    %48 = vector.load %arg4[%c0_15, %c0_16] : memref<384x128xf32, #tpu.memory_space<vmem>>, vector<384x128xf32>
    %cst_17 = arith.constant dense<0.000000e+00> : vector<32x128xf32>
    %49 = tpu.matmul %47, %48, %cst_17 {dimension_numbers = #tpu.dot_dimension_numbers<[1], [0], [0], [1], [0, 0, 1, 1], [], []>} : vector<32x384xf32>, vector<384x128xf32>, vector<32x128xf32> -> vector<32x128xf32>
    %c0_18 = arith.constant 0 : index
    %c0_19 = arith.constant 0 : index
    %50 = vector.load %arg5[%c0_18, %c0_19] : memref<1x128xf32, #tpu.memory_space<vmem>>, vector<1x128xf32>
    %51 = vector.broadcast %50 : vector<1x128xf32> to vector<32x128xf32>
    %52 = arith.addf %49, %51 : vector<32x128xf32>
    %c0_20 = arith.constant 0 : index
    %c0_21 = arith.constant 0 : index
    %53 = vector.load %arg6[%c0_20, %c0_21] : memref<32x128xf32, #tpu.memory_space<vmem>>, vector<32x128xf32>
    tpu.vector_store %arg6[%c0_20, %c0_21], %52 {strides = array<i32>} : memref<32x128xf32, #tpu.memory_space<vmem>>, vector<32x128xf32>,
    return
  }
  func.func @transform_0(%arg0: i32) -> (i32, i32, i32) {
    %c0_i32 = arith.constant 0 : i32
    %c0_i32_0 = arith.constant 0 : i32
    %c0_i32_1 = arith.constant 0 : i32
    %c0_i32_2 = arith.constant 0 : i32
    return %c0_i32, %c0_i32_0, %c0_i32_1 : i32, i32, i32
  }
  func.func @transform_1(%arg0: i32) -> (i32, i32) {
    %c0_i32 = arith.constant 0 : i32
    %c0_i32_0 = arith.constant 0 : i32
    %c0_i32_1 = arith.constant 0 : i32
    return %c0_i32, %c0_i32_0 : i32, i32
  }
  func.func @transform_2(%arg0: i32) -> (i32, i32) {
    %c0_i32 = arith.constant 0 : i32
    %c0_i32_0 = arith.constant 0 : i32
    %c0_i32_1 = arith.constant 0 : i32
    return %c0_i32, %c0_i32_0 : i32, i32
  }
  func.func @transform_3(%arg0: i32) -> (i32, i32) {
    %c0_i32 = arith.constant 0 : i32
    %c0_i32_0 = arith.constant 0 : i32
    %c0_i32_1 = arith.constant 0 : i32
    return %c0_i32, %c0_i32_0 : i32, i32
  }
  func.func @transform_4(%arg0: i32) -> (i32, i32) {
    %c0_i32 = arith.constant 0 : i32
    %c0_i32_0 = arith.constant 0 : i32
    %c0_i32_1 = arith.constant 0 : i32
    return %c0_i32, %c0_i32_0 : i32, i32
  }
  func.func @transform_5(%arg0: i32) -> (i32, i32) {
    %c0_i32 = arith.constant 0 : i32
    %c0_i32_0 = arith.constant 0 : i32
    %c0_i32_1 = arith.constant 0 : i32
    return %c0_i32, %c0_i32_0 : i32, i32
  }
}

</mosaic_0001>

<bundles_post_ra>
// kernel: tpu_custom_call.1
= control target key start
LH: loop header
LB: loop body
LE: loop exit
PB: predicated region body
PF: predicated region fallthrough
CT: control target
= control target key end

     0   :  { %10 = vsyncpa [#allocation3], 0  ;;  %s1420_s0 = inlined_call_operand.vmem [shape: f32[2,18,128], index: 0, kind: input, shape index: {}]   ;;  %s1421_s1 = inlined_call_operand.vmem [shape: f32[2,128], index: 1, kind: input, shape index: {}]   ;;  %s1422_s2 = inlined_call_operand.hbm [shape: f32[128,128], index: 2, kind: input, shape index: {}]   ;;  %s1423_s3 = inlined_call_operand.hbm [shape: f32[384,128], index: 3, kind: input, shape index: {}]   ;;  %s1424_s4 = inlined_call_operand.vmem [shape: f32[1,128], index: 4, kind: input, shape index: {}]   ;;  %s1425_s5 = inlined_call_operand.hbm [shape: f32[32,128], index: 5, kind: output, shape index: {}]  }
   0x1   :  { %11 = vsyncpa [#allocation6], 0 }
   0x2   :  { %12 = vsyncpa [#allocation4], 0  ;;  %s1086_s18 = smov [#allocation2]  }
   0x3   :  { %s22_s19 = sshll.u32 %s1086_s18, 4  ;;  %s23_s19 = int_to_ptr.vmem [resolvable:$true] %s22_s19 }
   0x4   :  { %s1028_s20 = scalar_lea.vmem %s23_s19, 2048  ;;  %p1033_p1 = scmp.lt.s32.totalorder %s23_s19, %s23_s19 }
   0x5   :  { %p1029_p0 = scmp.ne.s32.totalorder %s23_s19, %s1028_s20  ;;  %p1034_p2 = scmp.lt.s32.totalorder %s1028_s20, %s1028_s20 }
   0x7   :  { %p1035_p3 = por %p1034_p2, %p1033_p1 }
   0x9   :  { %p1036_p4 = pnand %p1035_p3, %p1029_p0 }
   0xb   :  { %1039 = shalt.err (!%p1036_p4)
}
   0xc   :  { %s1087_s21 = smov 128   ;;  %s1088_s22 = smov 8  }
   0xd   :  { %28 = dma.hbm_to_vmem [thread:$0]  %s1422_s2, 2048, %s23_s19, [#allocation3], %s1087_s21, %s1087_s21, %s1088_s22  }
   0xe   :  { %s1089_s25 = smov [#allocation5]  }
   0xf   :  { %s34_s26 = sshll.u32 %s1089_s25, 4  ;;  %s35_s26 = int_to_ptr.vmem [resolvable:$true] %s34_s26 }
  0x10   :  { %s1048_s27 = scalar_lea.vmem %s35_s26, 6144  ;;  %p1053_p6 = scmp.lt.s32.totalorder %s35_s26, %s35_s26 }
  0x11   :  { %p1049_p5 = scmp.ne.s32.totalorder %s35_s26, %s1048_s27  ;;  %p1054_p7 = scmp.lt.s32.totalorder %s1048_s27, %s1048_s27 }
  0x13   :  { %p1055_p8 = por %p1054_p7, %p1053_p6 }
  0x15   :  { %p1056_p9 = pnand %p1055_p8, %p1049_p5 }
  0x17   :  { %1059 = shalt.err (!%p1056_p9)
}
  0x18   :  { %40 = dma.hbm_to_vmem [thread:$0]  %s1423_s3, 6144, %s35_s26, [#allocation6], %s1087_s21, %s1087_s21, %s1088_s22  }
  0x19   :  { %1080 = dma.done.wait [#allocation3], 2048  }
  0x1a   :  { %1081 = vsyncadd [#allocation3], 4294965248 }
  0x1b   :  { %1082 = dma.done.wait [#allocation6], 6144  }
  0x1c   :  { %1083 = vsyncadd [#allocation6], 4294961152  ;;  %v1090_v0 = vmov 0.0   ;;  %vm1091_vm0 = vmmov 0   ;;  %v1092_v1 = vmov 1983009808   ;;  %v65_v3 = vlaneseq }
  0x1d   :  { %901 = vmatprep.subr.mxu0 %v1090_v0  ;;  %933 = vmatprep.mubr.msk.f32.mxu0 %vm1091_vm0, %v1090_v0  ;;  %v63_v2 = vunpack.c.l.s4 %v1092_v1  ;;  %v401_v6 = vld [vmem:[#allocation2 + $0x78] sm:$0xff]  ;;  %v400_v7 = vld [vmem:[#allocation2 + $0x70] sm:$0xff]  ;;  %v399_v8 = vld [vmem:[#allocation2 + $0x68] sm:$0xff]  ;;  %vm245_vm1 = vcmask 1043456   ;;  %vm382_vm2 = vcmask 1040384   ;;  %vm384_vm3 = vcmask 1041408  }
  0x1e   :  { %v1138_v5 = vshrl.u32 %v65_v3, 7  ;;  %902 = vmatpush3.msra.mxu0 %v401_v6  ;;  %v398_v10 = vld [vmem:[#allocation2 + $0x60] sm:$0xff]  ;;  %v397_v11 = vld [vmem:[#allocation2 + $0x58] sm:$0xff]  ;;  %v1153_v13 = vld [vmem:[%s1420_s0 + $0x8] sm:$0xff]  ;;  %vm539_vm6 = vcmask 1046528   ;;  %vm554_vm7 = vcmask 1045504  }
  0x1f   :  { %v64_v4 = vunpack.c.0.s8 %v63_v2  ;;  %903 = vmatprep.subr.mxu0 %v1090_v0  ;;  %v1148_v12 = vld [vmem:[%s1420_s0] sm:$0xff]  ;;  %v1159_v14 = vld [vmem:[%s1420_s0 + $0x10] sm:$0x3]  ;;  %v1164_v15 = vld [vmem:[%s1420_s0 + $0x18] sm:$0xff]  ;;  %v78_v19 = vcombine.high %v1153_v13, %v1153_v13 }
  0x20   :  { %904 = vmatpush3.msra.mxu0 %v400_v7  ;;  %v1169_v16 = vld [vmem:[%s1420_s0 + $0x20] sm:$0xff]  ;;  %v61_v17 = vcombine.high %v1148_v12, %v1148_v12  ;;  %v1184_v21 = vld [vmem:[%s1420_s0 + $0x28] sm:$0x3]  ;;  %v102_v23 = vcombine.high %v1164_v15, %v1164_v15  ;;  %v396_v26 = vld [vmem:[#allocation2 + $0x50] sm:$0xff]  ;;  %vm518_vm4 = vcmp.ge.s32.totalorder %v1138_v5, 1 }
  0x21   :  { %v1142_v9 = vsub.s32 %v64_v4, %v1138_v5  ;;  %905 = vmatprep.subr.mxu0 %v1090_v0  ;;  %v119_v25 = vcombine.high %v1169_v16, %v1169_v16  ;;  %v395_v35 = vld [vmem:[#allocation2 + $0x48] sm:$0xff]  ;;  %v394_v44 = vld [vmem:[#allocation2 + $0x40] sm:$0xff]  ;;  %v393_v53 = vld [vmem:[#allocation2 + $0x38] sm:$0xff] }
  0x22   :  { %906 = vmatpush3.msra.mxu0 %v399_v8  ;;  %v392_v62 = vld [vmem:[#allocation2 + $0x30] sm:$0xff] }
  0x23   :  { %907 = vmatprep.subr.mxu0 %v1090_v0  ;;  %v68_v18 = vrot.slane %v1148_v12, %v1142_v9  ;;  %v1179_v20 = vrot.slane %v1153_v13, %v1142_v9  ;;  %v1188_v22 = vrot.slane %v1159_v14, %v1142_v9  ;;  %v1194_v24 = vrot.slane %v1164_v15, %v1142_v9 }
  0x24   :  { %908 = vmatpush3.msra.mxu0 %v398_v10  ;;  %v75_v27 = vrot.slane %v61_v17, %v1142_v9  ;;  %v92_v29 = vrot.slane %v78_v19, %v1142_v9  ;;  %v1204_v31 = vrot.slane %v102_v23, %v1142_v9  ;;  %v1210_v33 = vrot.slane %v1169_v16, %v1142_v9  ;;  %v391_v10 = vld [vmem:[#allocation2 + $0x28] sm:$0xff] }
  0x25   :  { %909 = vmatprep.subr.mxu0 %v1090_v0  ;;  %v76_v28 = vcombine.high %v68_v18, %v68_v18  ;;  %v93_v30 = vcombine.high %v1179_v20, %v1179_v20  ;;  %v117_v32 = vcombine.high %v1194_v24, %v1194_v24  ;;  %v1213_v34 = vrot.slane %v119_v25, %v1142_v9 }
  0x26   :  { %910 = vmatpush3.msra.mxu0 %v397_v11  ;;  %v77_v36 = vcombine.high %v75_v27, %v75_v27  ;;  %v94_v37 = vcombine.high %v92_v29, %v92_v29  ;;  %v1218_v38 = vrot.slane %v1184_v21, %v1142_v9  ;;  %v118_v40 = vcombine.high %v1204_v31, %v1204_v31 }
  0x27   :  { %911 = vmatprep.subr.mxu0 %v1090_v0  ;;  %v161_v39 = vcombine.low %v68_v18, %v76_v28  ;;  %v134_v41 = vcombine.high %v1210_v33, %v1210_v33  ;;  %v135_v42 = vcombine.high %v1213_v34, %v1213_v34  ;;  %v178_v43 = vcombine.low %v1179_v20, %v93_v30 }
  0x28   :  { %912 = vmatpush3.msra.mxu0 %v396_v26  ;;  %v162_v45 = vcombine.low %v75_v27, %v77_v36  ;;  %v179_v47 = vcombine.low %v92_v29, %v94_v37  ;;  %v195_v48 = vcombine.low %v1188_v22, %v1194_v24  ;;  %v196_v50 = vcombine.low %v117_v32, %v1204_v31 }
  0x29   :  { %913 = vmatprep.subr.mxu0 %v1090_v0  ;;  %v169_v46 = vrot.slane %v161_v39, %v1142_v9  ;;  %v186_v49 = vrot.slane %v178_v43, %v1142_v9  ;;  %v212_v51 = vcombine.low %v118_v40, %v1210_v33  ;;  %v213_v52 = vcombine.low %v134_v41, %v1213_v34 }
  0x2a   :  { %914 = vmatpush3.msra.mxu0 %v395_v35  ;;  %v176_v54 = vrot.slane %v162_v45, %v1142_v9  ;;  %v193_v55 = vrot.slane %v179_v47, %v1142_v9  ;;  %v203_v56 = vrot.slane %v195_v48, %v1142_v9  ;;  %v229_v57 = vcombine.low %v135_v42, %v1218_v38 }
  0x2b   :  { %915 = vmatprep.subr.mxu0 %v1090_v0  ;;  %v210_v58 = vrot.slane %v196_v50, %v1142_v9  ;;  %v220_v59 = vrot.slane %v212_v51, %v1142_v9  ;;  %v227_v60 = vrot.slane %v213_v52, %v1142_v9  ;;  %v254_v61 = vmul.f32 %v68_v18, %v68_v18  ;;  %v387_v52 = vld [vmem:[#allocation2 + $0x8] sm:$0xff] }
  0x2c   :  { %916 = vmatpush3.msra.mxu0 %v394_v44  ;;  %v177_v63 = vcombine.low %v169_v46, %v176_v54  ;;  %v194_v1 = vcombine.low %v186_v49, %v193_v55  ;;  %v236_v2 = vrot.slane %v229_v57, %v1142_v9  ;;  %v255_v3 = vmul.f32 %v76_v28, %v76_v28  ;;  %v390_v28 = vld [vmem:[#allocation2 + $0x20] sm:$0xff] }
  0x2d   :  { %917 = vmatprep.subr.mxu0 %v1090_v0  ;;  %v211_v4 = vcombine.low %v203_v56, %v210_v58  ;;  %v228_v6 = vcombine.low %v220_v59, %v227_v60  ;;  %v256_v7 = vmul.f32 %v75_v27, %v75_v27  ;;  %v257_v8 = vmul.f32 %v77_v36, %v77_v36  ;;  %v386_v60 = vld [vmem:[#allocation2] sm:$0xff] }
  0x2e   :  { %918 = vmatpush3.msra.mxu0 %v393_v53  ;;  %v242_v11 = vadd.f32 %v194_v1, %v177_v63  ;;  %v246_v17 = vsel %vm245_vm1, %v236_v2, 0.0  ;;  %v258_v18 = vmul.f32 %v1179_v20, %v1179_v20  ;;  %v259_v19 = vmul.f32 %v93_v30, %v93_v30 }
  0x2f   :  { %919 = vmatprep.subr.mxu0 %v1090_v0  ;;  %v260_v23 = vmul.f32 %v92_v29, %v92_v29  ;;  %v261_v25 = vmul.f32 %v94_v37, %v94_v37  ;;  %v262_v26 = vmul.f32 %v1188_v22, %v1188_v22  ;;  %v263_v27 = vmul.f32 %v1194_v24, %v1194_v24  ;;  %v389_v24 = vld [vmem:[#allocation2 + $0x18] sm:$0xff] }
  0x30   :  { %920 = vmatpush3.msra.mxu0 %v392_v62  ;;  %v243_v35 = vadd.f32 %v242_v11, %v211_v4  ;;  %v264_v36 = vmul.f32 %v117_v32, %v117_v32  ;;  %v265_v39 = vmul.f32 %v1204_v31, %v1204_v31  ;;  %v266_v43 = vmul.f32 %v118_v40, %v118_v40 }
  0x31   :  { %921 = vmatprep.subr.mxu0 %v1090_v0  ;;  %v267_v20 = vmul.f32 %v1210_v33, %v1210_v33  ;;  %v268_v29 = vmul.f32 %v134_v41, %v134_v41  ;;  %v269_v22 = vmul.f32 %v1213_v34, %v1213_v34  ;;  %v270_v30 = vmul.f32 %v135_v42, %v135_v42  ;;  %v388_v33 = vld [vmem:[#allocation2 + $0x10] sm:$0xff] }
  0x32   :  { %922 = vmatpush3.msra.mxu0 %v391_v10  ;;  %v244_v37 = vadd.f32 %v243_v35, %v228_v6  ;;  %v271_v32 = vmul.f32 %v1218_v38, %v1218_v38  ;;  %v290_v44 = vcombine.low %v254_v61, %v255_v3  ;;  %v291_v45 = vcombine.low %v256_v7, %v257_v8  ;;  %v1277_v35 = vld [vmem:[#allocation5 + $0x178] sm:$0xff] }
  0x33   :  { %923 = vmatprep.subr.mxu0 %v1090_v0  ;;  %v307_v31 = vcombine.low %v258_v18, %v259_v19  ;;  %v308_v40 = vcombine.low %v260_v23, %v261_v25  ;;  %v324_v46 = vcombine.low %v262_v26, %v263_v27  ;;  %v325_v47 = vcombine.low %v264_v36, %v265_v39  ;;  %v600_v27 = vld [vmem:[#allocation5 + $0xf8] sm:$0xff]  ;;  %v599_v36 = vld [vmem:[#allocation5 + $0xf0] sm:$0xff] }
  0x34   :  { %924 = vmatpush3.msra.mxu0 %v390_v28  ;;  %v247_v41 = vadd.f32 %v246_v17, %v244_v37  ;;  %v298_v34 = vrot.slane %v290_v44, %v1142_v9  ;;  %v305_v42 = vrot.slane %v291_v45, %v1142_v9  ;;  %v341_v48 = vcombine.low %v266_v43, %v267_v20  ;;  %v584_v28 = vld [vmem:[#allocation5 + $0x78] sm:$0xff]  ;;  %v583_v39 = vld [vmem:[#allocation5 + $0x70] sm:$0xff]  ;;  %v598_v20 = vld [vmem:[#allocation5 + $0xe8] sm:$0xff] }
  0x35   :  { %925 = vmatprep.subr.mxu0 %v1090_v0  ;;  %v315_v49 = vrot.slane %v307_v31, %v1142_v9  ;;  %v322_v38 = vrot.slane %v308_v40, %v1142_v9  ;;  %v332_v50 = vrot.slane %v324_v46, %v1142_v9  ;;  %v339_v51 = vrot.slane %v325_v47, %v1142_v9  ;;  %v1281_v43 = vld [vmem:[#allocation5 + $0x170] sm:$0xff]  ;;  %v1289_v37 = vld [vmem:[#allocation5 + $0x160] sm:$0xff]  ;;  %v580_v44 = vld [vmem:[#allocation5 + $0x58] sm:$0xff] }
  0x36   :  { %926 = vmatpush3.msra.mxu0 %v389_v24  ;;  %v248_v53 = vrot.slane %v247_v41, 4  ;;  %v306_v54 = vcombine.low %v298_v34, %v305_v42  ;;  %v342_v55 = vcombine.low %v268_v29, %v269_v22  ;;  %v349_v56 = vrot.slane %v341_v48, %v1142_v9  ;;  %837 = vmatprep.subr.mxu1 %v600_v27  ;;  %v582_v29 = vld [vmem:[#allocation5 + $0x68] sm:$0xff]  ;;  %v581_v24 = vld [vmem:[#allocation5 + $0x60] sm:$0xff]  ;;  %v1293_v45 = vld [vmem:[#allocation5 + $0x158] sm:$0xff] }
  0x37   :  { %927 = vmatprep.subr.mxu0 %v1090_v0  ;;  %v323_v57 = vcombine.low %v315_v49, %v322_v38  ;;  %v340_v58 = vcombine.low %v332_v50, %v339_v51  ;;  %v358_v59 = vcombine.low %v270_v30, %v271_v32  ;;  %838 = vmatpush3.msra.mxu1 %v584_v28  ;;  %v1285_v22 = vld [vmem:[#allocation5 + $0x168] sm:$0xff]  ;;  %v597_v30 = vld [vmem:[#allocation5 + $0xe0] sm:$0xff]  ;;  %v596_v32 = vld [vmem:[#allocation5 + $0xd8] sm:$0xff]  ;;  %v490_v28 = vsub.s32 0, %v1138_v5 }
  0x38   :  { %928 = vmatpush3.msra.mxu0 %v388_v33  ;;  %v356_v61 = vrot.slane %v342_v55, %v1142_v9  ;;  %v249_v62 = vadd.f32 %v248_v53, %v247_v41  ;;  %839 = vmatprep.subr.mxu1 %v599_v36  ;;  %v595_v31 = vld [vmem:[#allocation5 + $0xd0] sm:$0xff]  ;;  %v594_v47 = vld [vmem:[#allocation5 + $0xc8] sm:$0xff]  ;;  %v593_v34 = vld [vmem:[#allocation5 + $0xc0] sm:$0xff] }
  0x39   :  { %929 = vmatprep.subr.mxu0 %v1090_v0  ;;  %v365_v63 = vrot.slane %v358_v59, %v1142_v9  ;;  %v371_v1 = vadd.f32 %v323_v57, %v306_v54  ;;  %840 = vmatpush3.msra.mxu1 %v583_v39  ;;  %v579_v40 = vld [vmem:[#allocation5 + $0x50] sm:$0xff]  ;;  %v578_v33 = vld [vmem:[#allocation5 + $0x48] sm:$0xff]  ;;  %v577_v42 = vld [vmem:[#allocation5 + $0x40] sm:$0xff] }
  0x3a   :  { %930 = vmatpush3.msra.mxu0 %v387_v52  ;;  %v357_v2 = vcombine.low %v349_v56, %v356_v61  ;;  %v250_v6 = vrot.slane %v249_v62, 2  ;;  %841 = vmatprep.subr.mxu1 %v598_v20  ;;  %v1297_v46 = vld [vmem:[#allocation5 + $0x150] sm:$0xff]  ;;  %v1301_v41 = vld [vmem:[#allocation5 + $0x148] sm:$0xff]  ;;  %v1305_v48 = vld [vmem:[#allocation5 + $0x140] sm:$0xff] }
  0x3b   :  { %931 = vmatprep.subr.mxu0 %v1090_v0  ;;  %v372_v3 = vadd.f32 %v371_v1, %v340_v58  ;;  %v374_v4 = vsel %vm245_vm1, %v365_v63, 0.0  ;;  %842 = vmatpush3.msra.mxu1 %v582_v29  ;;  %v592_v49 = vld [vmem:[#allocation5 + $0xb8] sm:$0xff]  ;;  %v591_v51 = vld [vmem:[#allocation5 + $0xb0] sm:$0xff]  ;;  %v590_v54 = vld [vmem:[#allocation5 + $0xa8] sm:$0xff] }
  0x3c   :  { %932 = vmatpush3.msra.mxu0 %v386_v60  ;;  %v251_v10 = vadd.f32 %v250_v6, %v249_v62  ;;  %843 = vmatprep.subr.mxu1 %v597_v30  ;;  %v576_v38 = vld [vmem:[#allocation5 + $0x38] sm:$0xff]  ;;  %v575_v52 = vld [vmem:[#allocation5 + $0x30] sm:$0xff]  ;;  %v574_v55 = vld [vmem:[#allocation5 + $0x28] sm:$0xff] }
  0x3d   :  { %v373_v7 = vadd.f32 %v372_v3, %v357_v2  ;;  %936 = vmatprep.subr.mxu0 %v1277_v35  ;;  %844 = vmatpush3.msra.mxu1 %v581_v24  ;;  %v1309_v50 = vld [vmem:[#allocation5 + $0x138] sm:$0xff]  ;;  %v1313_v53 = vld [vmem:[#allocation5 + $0x130] sm:$0xff]  ;;  %v1317_v56 = vld [vmem:[#allocation5 + $0x128] sm:$0xff] }
  0x3e   :  { %v252_v18 = vrot.slane %v251_v10, 1  ;;  %845 = vmatprep.subr.mxu1 %v596_v32  ;;  %v589_v57 = vld [vmem:[#allocation5 + $0xa0] sm:$0xff]  ;;  %v588_v60 = vld [vmem:[#allocation5 + $0x98] sm:$0xff]  ;;  %v587_v63 = vld [vmem:[#allocation5 + $0x90] sm:$0xff]  ;;  %v517_v32 = vadd.s32 16, %v1138_v5 }
  0x3f   :  { %v375_v8 = vadd.f32 %v374_v4, %v373_v7  ;;  %846 = vmatpush3.msra.mxu1 %v580_v44  ;;  %v573_v58 = vld [vmem:[#allocation5 + $0x20] sm:$0xff]  ;;  %v572_v61 = vld [vmem:[#allocation5 + $0x18] sm:$0xff]  ;;  %v571_v1 = vld [vmem:[#allocation5 + $0x10] sm:$0xff] }
  0x40   :  { %v253_v25 = vadd.f32 %v252_v18, %v251_v10  ;;  %847 = vmatprep.subr.mxu1 %v595_v31  ;;  %v1321_v59 = vld [vmem:[#allocation5 + $0x120] sm:$0xff]  ;;  %v1324_v62 = vld [vmem:[#allocation5 + $0x118] sm:$0xff]  ;;  %v1327_v2 = vld [vmem:[#allocation5 + $0x110] sm:$0xff]  ;;  %vm523_vm5 = vcmp.lt.s32.totalorder %v517_v32, 17 }
  0x41   :  { %v376_v11 = vrot.slane %v375_v8, 4  ;;  %848 = vmatpush3.msra.mxu1 %v579_v40  ;;  %v586_v3 = vld [vmem:[#allocation5 + $0x88] sm:$0xff]  ;;  %v585_v7 = vld [vmem:[#allocation5 + $0x80] sm:$0xff] }
  0x42   :  { %849 = vmatprep.subr.mxu1 %v594_v47  ;;  %v570_v4 = vld [vmem:[#allocation5 + $0x8] sm:$0xff]  ;;  %v1335_v10 = vld [vmem:[#allocation5 + $0x100] sm:$0xff] }
  0x43   :  { %v377_v17 = vadd.f32 %v376_v11, %v375_v8  ;;  %850 = vmatpush3.msra.mxu1 %v578_v33  ;;  %v1331_v6 = vld [vmem:[#allocation5 + $0x108] sm:$0xff]  ;;  %v569_v8 = vld [vmem:[#allocation5] sm:$0xff] }
  0x44   :  { %851 = vmatprep.subr.mxu1 %v593_v34  ;;  %v479_v39 = vld [vmem:[%s1421_s1 + $0x1] sm:$0x1] }
  0x45   :  { %v378_v19 = vrot.slane %v377_v17, 2  ;;  %852 = vmatpush3.msra.mxu1 %v577_v42 }
  0x46   :  { %853 = vmatprep.subr.mxu1 %v592_v49 }
  0x47   :  { %v379_v23 = vadd.f32 %v378_v19, %v377_v17  ;;  %854 = vmatpush3.msra.mxu1 %v576_v38 }
  0x48   :  { %855 = vmatprep.subr.mxu1 %v591_v51 }
  0x49   :  { %v380_v26 = vrot.slane %v379_v23, 1  ;;  %856 = vmatpush3.msra.mxu1 %v575_v52 }
  0x4a   :  { %857 = vmatprep.subr.mxu1 %v590_v54 }
  0x4b   :  { %v381_v9 = vadd.f32 %v380_v26, %v379_v23  ;;  %858 = vmatpush3.msra.mxu1 %v574_v55 }
  0x4c   :  { %859 = vmatprep.subr.mxu1 %v589_v57 }
  0x4d   :  { %v383_v0 = vsel %vm382_vm2, %v253_v25, %v381_v9  ;;  %860 = vmatpush3.msra.mxu1 %v573_v58 }
  0x4e   :  { %934 = vmatmul.mubr.msk.f32.vlgmr.msra.gmra.mxu0 %vm384_vm3, %v383_v0  ;;  %861 = vmatprep.subr.mxu1 %v588_v60  ;;  %v478_v0 = vld [vmem:[%s1421_s1] sm:$0x1] }
  0x4f   :  { %937 = vmatpush3.msra.mxu0 %v1277_v35  ;;  %862 = vmatpush3.msra.mxu1 %v572_v61 }
  0x50   :  { %938 = vmatprep.subr.mxu0 %v1281_v43  ;;  %863 = vmatprep.subr.mxu1 %v587_v63 }
  0x51   :  { %939 = vmatpush3.msra.mxu0 %v1281_v43  ;;  %864 = vmatpush3.msra.mxu1 %v571_v1 }
  0x52   :  { %940 = vmatprep.subr.mxu0 %v1285_v22  ;;  %865 = vmatprep.subr.mxu1 %v586_v3 }
  0x53   :  { %941 = vmatpush3.msra.mxu0 %v1285_v22  ;;  %866 = vmatpush3.msra.mxu1 %v570_v4 }
  0x54   :  { %942 = vmatprep.subr.mxu0 %v1289_v37  ;;  %867 = vmatprep.subr.mxu1 %v585_v7 }
  0x55   :  { %943 = vmatpush3.msra.mxu0 %v1289_v37  ;;  %868 = vmatpush3.msra.mxu1 %v569_v8 }
  0x56   :  { %944 = vmatprep.subr.mxu0 %v1293_v45  ;;  %974 = vmatprep.subr.mxu1 %v1277_v35 }
  0x57   :  { %945 = vmatpush3.msra.mxu0 %v1293_v45 }
  0x58   :  { %946 = vmatprep.subr.mxu0 %v1297_v46 }
  0x59   :  { %947 = vmatpush3.msra.mxu0 %v1297_v46 }
  0x5a   :  { %948 = vmatprep.subr.mxu0 %v1301_v41 }
  0x5b   :  { %949 = vmatpush3.msra.mxu0 %v1301_v41 }
  0x5c   :  { %950 = vmatprep.subr.mxu0 %v1305_v48 }
  0x5d   :  { %951 = vmatpush3.msra.mxu0 %v1305_v48 }
  0x5e   :  { %952 = vmatprep.subr.mxu0 %v1309_v50 }
  0x5f   :  { %953 = vmatpush3.msra.mxu0 %v1309_v50 }
  0x60   :  { %954 = vmatprep.subr.mxu0 %v1313_v53 }
  0x61   :  { %955 = vmatpush3.msra.mxu0 %v1313_v53 }
  0x62   :  { %956 = vmatprep.subr.mxu0 %v1317_v56 }
  0x63   :  { %957 = vmatpush3.msra.mxu0 %v1317_v56 }
  0x64   :  { %958 = vmatprep.subr.mxu0 %v1321_v59 }
  0x65   :  { %959 = vmatpush3.msra.mxu0 %v1321_v59 }
  0x66   :  { %960 = vmatprep.subr.mxu0 %v1324_v62 }
  0x67   :  { %961 = vmatpush3.msra.mxu0 %v1324_v62 }
  0x68   :  { %962 = vmatprep.subr.mxu0 %v1327_v2 }
  0x69   :  { %963 = vmatpush3.msra.mxu0 %v1327_v2 }
  0x6a   :  { %964 = vmatprep.subr.mxu0 %v1331_v6 }
  0x6b   :  { %965 = vmatpush3.msra.mxu0 %v1331_v6 }
  0x6c   :  { %966 = vmatprep.subr.mxu0 %v1335_v10 }
  0x6d   :  { %967 = vmatpush3.msra.mxu0 %v1335_v10 }
 0x10e   :  { %v468_v11 = vpop.f32.mrf.mxu0 }
 0x10f   :  { %v472_v17 = vmul.f32 0.001953125, %v468_v11 }
 0x110   :  { %v935_v18 = vpop.f32.mrf.mxu0 }
 0x111   :  { %v473_v19 = vmul.f32 %v472_v17, %v472_v17 }
 0x113   :  { %v475_v23 = vrot.slane %v473_v19, 7 }
 0x115   :  { %v477_v25 = vsub.f32 %v472_v17, %v475_v23 }
 0x117   :  { %v480_v26 = vadd.f32 1e-05, %v477_v25 }
 0x119   :  { %1018 = vrsqrt.f32 %v480_v26 }
 0x126   :  { %v1019_v9 = vpop.eup %1018 }
 0x127   :  { %v483_v27 = vrot.slane %v1019_v9, 1 }
 0x129   :  { %v485_v36 = vmul.f32 %v483_v27, %v478_v0 }
 0x12b   :  { %v486_v20 = vmul.f32 %v485_v36, %v472_v17  ;;  %v491_v29 = vrot.slane %v485_v36, %v490_v28 }
 0x12d   :  { %v487_v30 = vsub.f32 %v479_v39, %v486_v20  ;;  %v492_v24 = vmul.f32 %v491_v29, %v1148_v12  ;;  %v493_v31 = vmul.f32 %v491_v29, %v1153_v13  ;;  %v494_v40 = vmul.f32 %v491_v29, %v1159_v14 }
 0x12e   :  { %v495_v47 = vmul.f32 %v491_v29, %v1164_v15  ;;  %v496_v33 = vmul.f32 %v491_v29, %v1169_v16  ;;  %v497_v34 = vmul.f32 %v491_v29, %v1184_v21 }
 0x12f   :  { %v501_v44 = vrot.slane %v487_v30, %v490_v28 }
 0x131   :  { %v502_v42 = vadd.f32 %v501_v44, %v492_v24  ;;  %v503_v49 = vadd.f32 %v501_v44, %v493_v31  ;;  %v504_v38 = vadd.f32 %v501_v44, %v494_v40  ;;  %v505_v51 = vadd.f32 %v501_v44, %v495_v47 }
 0x132   :  { %v506_v12 = vadd.f32 %v501_v44, %v496_v33  ;;  %v507_v52 = vadd.f32 %v501_v44, %v497_v34 }
 0x133   :  { %v508_v54 = vmax.f32 %v502_v42, 0.0  ;;  %v509_v55 = vmax.f32 %v503_v49, 0.0  ;;  %v510_v13 = vmax.f32 %v504_v38, 0.0  ;;  %v511_v57 = vmax.f32 %v505_v51, 0.0 }
 0x134   :  { %v1357_v14 = vmax.f32 %v506_v12, 0.0  ;;  %v513_v4 = vmax.f32 %v507_v52, 0.0 }
 0x135   :  { %v527_v15 = vsel %vm518_vm4, %v508_v54, 0.0  ;;  %v541_v16 = vrot.slane %v509_v55, 1  ;;  %v556_v21 = vrot.slane %v509_v55, 2  ;;  %v529_v58 = vsel %vm523_vm5, %v510_v13, 0.0 }
 0x136   :  { %v540_v60 = vrot.slane %v527_v15, 1  ;;  %v555_v61 = vrot.slane %v527_v15, 2  ;;  %v558_v63 = vrot.slane %v529_v58, 2  ;;  %v543_v1 = vrot.slane %v529_v58, 1 }
 0x137   :  { %v530_v3 = vsel %vm518_vm4, %v511_v57, 0.0  ;;  %v546_v19 = vrot.slane %v1357_v14, 1  ;;  %v532_v23 = vsel %vm523_vm5, %v513_v4, 0.0  ;;  %v561_v9 = vrot.slane %v1357_v14, 2 }
 0x138   :  { %v542_v7 = vsel %vm539_vm6, %v540_v60, %v541_v16  ;;  %v557_v8 = vsel %vm554_vm7, %v555_v61, %v556_v21  ;;  %v559_v11 = vsel %vm554_vm7, %v556_v21, %v558_v63  ;;  %v544_v17 = vsel %vm539_vm6, %v541_v16, %v543_v1 }
 0x139   :  { %688 = vmatprep.mubr.f32.mxu1 %v542_v7  ;;  %968 = vmatprep.mubr.f32.mxu0 %v557_v8  ;;  %v545_v18 = vrot.slane %v530_v3, 1  ;;  %v548_v26 = vrot.slane %v532_v23, 1  ;;  %v563_v5 = vrot.slane %v532_v23, 2 }
 0x13a   :  { %818 = vmatmul.mubr.msk.f32.vlgmr.msra.gmra.mxu1 %vm518_vm4, %v508_v54  ;;  %969 = vmatmul.mubr.f32.vlgmr.msra.gmra.mxu0 %v559_v11 }
 0x13b   :  { %990 = vmatpush3.msra.mxu1 %v1277_v35  ;;  %693 = vmatprep.mubr.f32.mxu1 %v544_v17  ;;  %v547_v25 = vsel %vm539_vm6, %v545_v18, %v546_v19  ;;  %v549_v35 = vsel %vm539_vm6, %v546_v19, %v548_v26 }
 0x13c   :  { %975 = vmatprep.subr.mxu1 %v1281_v43 }
 0x13d   :  { %991 = vmatpush3.msra.mxu1 %v1281_v43  ;;  %v560_v43 = vrot.slane %v530_v3, 2 }
 0x13e   :  { %976 = vmatprep.subr.mxu1 %v1285_v22  ;;  %694 = vmatmul.mubr.f32.gmra.mxu1 %v509_v55 }
 0x13f   :  { %992 = vmatpush3.msra.mxu1 %v1285_v22  ;;  %698 = vmatprep.mubr.f32.mxu1 %v547_v25  ;;  %v562_v22 = vsel %vm554_vm7, %v560_v43, %v561_v9 }
 0x140   :  { %977 = vmatprep.subr.mxu1 %v1289_v37 }
 0x141   :  { %993 = vmatpush3.msra.mxu1 %v1289_v37  ;;  %v564_v37 = vsel %vm554_vm7, %v561_v9, %v563_v5 }
 0x142   :  { %978 = vmatprep.subr.mxu1 %v1293_v45  ;;  %819 = vmatmul.mubr.msk.f32.gmra.mxu1 %vm518_vm4, %v511_v57 }
 0x143   :  { %994 = vmatpush3.msra.mxu1 %v1293_v45  ;;  %703 = vmatprep.mubr.f32.mxu1 %v549_v35 }
 0x144   :  { %979 = vmatprep.subr.mxu1 %v1297_v46 }
 0x145   :  { %995 = vmatpush3.msra.mxu1 %v1297_v46 }
 0x146   :  { %980 = vmatprep.subr.mxu1 %v1301_v41  ;;  %704 = vmatmul.mubr.f32.gmra.mxu1 %v1357_v14 }
 0x147   :  { %996 = vmatpush3.msra.mxu1 %v1301_v41  ;;  %971 = vmatprep.mubr.f32.mxu1 %v562_v22 }
 0x148   :  { %981 = vmatprep.subr.mxu1 %v1305_v48 }
 0x149   :  { %997 = vmatpush3.msra.mxu1 %v1305_v48  ;;  %v817_v48 = vld [vmem:[%s1424_s4] ss:$0 sm:$0xff]  ;;  %s1093_s4 = smov [#allocation7]  }
 0x14a   :  { %982 = vmatprep.subr.mxu1 %v1309_v50  ;;  %s803_s19 = sshll.u32 %s1093_s4, 4  ;;  %s804_s19 = int_to_ptr.vmem [resolvable:$true] %s803_s19 }
 0x14b   :  { %998 = vmatpush3.msra.mxu1 %v1309_v50  ;;  %s1060_s20 = scalar_lea.vmem %s804_s19, 512  ;;  %p1065_p11 = scmp.lt.s32.totalorder %s804_s19, %s804_s19 }
 0x14c   :  { %983 = vmatprep.subr.mxu1 %v1313_v53  ;;  %p1061_p10 = scmp.ne.s32.totalorder %s804_s19, %s1060_s20  ;;  %p1066_p12 = scmp.lt.s32.totalorder %s1060_s20, %s1060_s20 }
 0x14d   :  { %999 = vmatpush3.msra.mxu1 %v1313_v53 }
 0x14e   :  { %984 = vmatprep.subr.mxu1 %v1317_v56  ;;  %p1067_p13 = por %p1066_p12, %p1065_p11 }
 0x14f   :  { %1000 = vmatpush3.msra.mxu1 %v1317_v56 }
 0x150   :  { %985 = vmatprep.subr.mxu1 %v1321_v59  ;;  %p1068_p0 = pnand %p1067_p13, %p1061_p10 }
 0x151   :  { %1001 = vmatpush3.msra.mxu1 %v1321_v59 }
 0x152   :  { %986 = vmatprep.subr.mxu1 %v1324_v62 }
 0x153   :  { %1002 = vmatpush3.msra.mxu1 %v1324_v62 }
 0x154   :  { %987 = vmatprep.subr.mxu1 %v1327_v2 }
 0x155   :  { %1003 = vmatpush3.msra.mxu1 %v1327_v2 }
 0x156   :  { %988 = vmatprep.subr.mxu1 %v1331_v6 }
 0x157   :  { %1004 = vmatpush3.msra.mxu1 %v1331_v6 }
 0x158   :  { %989 = vmatprep.subr.mxu1 %v1335_v10 }
 0x159   :  { %1005 = vmatpush3.msra.mxu1 %v1335_v10 }
 0x15a   :  { %972 = vmatmul.mubr.f32.vlgmr.msra.gmra.mxu1 %v564_v37 }
 0x1fa   :  { %v869_v45 = vpop.f32.mrf.mxu1  ;;  %v970_v46 = vpop.f32.mrf.mxu0 }
 0x1fc   :  { %v870_v41 = vpop.f32.mrf.mxu1  ;;  %v775_v59 = vpop.f32.mrf.mxu0 }
 0x1fd   :  { %v871_v50 = vadd.f32 %v870_v41, %v869_v45 }
 0x1fe   :  { %v872_v53 = vpop.f32.mrf.mxu1 }
 0x1ff   :  { %v691_v56 = vadd.f32 %v871_v50, %v817_v48 }
 0x200   :  { %v873_v62 = vpop.f32.mrf.mxu1 }
 0x201   :  { %v776_v2 = vadd.f32 %v775_v59, %v691_v56  ;;  %v874_v6 = vadd.f32 %v873_v62, %v872_v53 }
 0x202   :  { %v875_v27 = vpop.f32.mrf.mxu1 }
 0x203   :  { %794 = vst [vmem:[#allocation7] sm:$0xff] %v776_v2  ;;  %v696_v0 = vadd.f32 %v874_v6, %v817_v48 }
 0x204   :  { %v876_v28 = vpop.f32.mrf.mxu1 }
 0x205   :  { %v781_v10 = vadd.f32 %v970_v46, %v696_v0  ;;  %v877_v29 = vadd.f32 %v876_v28, %v875_v27 }
 0x206   :  { %v878_v36 = vpop.f32.mrf.mxu1 }
 0x207   :  { %795 = vst [vmem:[#allocation7 + $0x8] sm:$0xff] %v781_v10  ;;  %v701_v44 = vadd.f32 %v877_v29, %v817_v48 }
 0x208   :  { %v879_v39 = vpop.f32.mrf.mxu1 }
 0x209   :  { %v880_v20 = vadd.f32 %v879_v39, %v878_v36 }
 0x20b   :  { %v706_v30 = vadd.f32 %v880_v20, %v817_v48 }
 0x21a   :  { %v973_v24 = vpop.f32.mrf.mxu1 }
 0x21b   :  { %v791_v32 = vadd.f32 %v973_v24, %v706_v30 }
 0x21c   :  { %v785_v31 = vpop.f32.mrf.mxu1 }
 0x21d   :  { %797 = vst [vmem:[#allocation7 + $0x18] sm:$0xff] %v791_v32  ;;  %v786_v40 = vadd.f32 %v785_v31, %v701_v44 }
 0x21f   :  { %796 = vst [vmem:[#allocation7 + $0x10] sm:$0xff] %v786_v40 }
 0x220   :  { %1071 = shalt.err (!%p1068_p0)
}
 0x221   :  { %809 = dma.vmem_to_hbm [thread:$0]  %s804_s19, 512, %s1425_s5, [#allocation4], %s1087_s21, %s1087_s21, %s1088_s22  }
 0x222   :  { %1084 = dma.done.wait [#allocation4], 512  }
 0x223   :  { %1085 = vsyncadd [#allocation4], 4294966784 }
 0x224   :  { %813 = vsyncpa [#allocation3], 1 }
 0x225   :  { %814 = vsyncpa [#allocation6], 1 }
 0x226   :  { %815 = vsyncpa [#allocation4], 1 }

</bundles_post_ra>
